<compile_context>
chip_gen: v6e
topology: v6e:2x2x1
jax: 0.10.0
libtpu: 0.0.40
codegen_flags: <defaults>
</compile_context>

<pallas_src>
import functools

import jax
import jax.numpy as jnp
from jax.experimental import pallas as pl
from jax.experimental.pallas import tpu as pltpu


def _round_up(x, m):
    return (x + m - 1) // m * m


# --------------------------------------------------------------------------
# Kernel
# --------------------------------------------------------------------------
def _sae_kernel(x_ref, w_enc_ref, w_dec_ref, b_enc_ref, b_dec_ref,
                recon_ref, acts_ref, part_ref, *scratch,
                l1_coeff, batch_total, tm, th, acc_in_out):
    if acc_in_out:
        (l1_ref,) = scratch
        acc_ref = recon_ref            # fp32 output block doubles as accumulator
    else:
        acc_ref, l1_ref = scratch      # separate fp32 accumulator (bf16/fp16)

    i = pl.program_id(0)               # batch tile   (parallel)
    j = pl.program_id(1)               # hidden tile  (arbitrary / reduction)
    nj = pl.num_programs(1)

    @pl.when(j == 0)
    def _init():
        acc_ref[...] = jnp.zeros_like(acc_ref)
        l1_ref[...] = jnp.zeros_like(l1_ref)

    x = x_ref[...]                     # (tm, d_mlp), input dtype
    b_dec = b_dec_ref[...]             # (1, d_mlp)
    x_cent = x - b_dec                 # redone per hidden tile (cheap VPU filler)

    # Encoder tile: (tm, d_mlp) @ (d_mlp, th) on the MXU, fp32 accumulation.
    pre = jnp.dot(x_cent, w_enc_ref[...], preferred_element_type=jnp.float32)
    pre = pre + b_enc_ref[...].astype(jnp.float32)
    acts_f32 = jnp.maximum(pre, 0.0)                       # ReLU
    acts = acts_f32.astype(acts_ref.dtype)
    acts_ref[...] = acts

    # Decoder partial product accumulated into the resident fp32 accumulator.
    acc_ref[...] += jnp.dot(acts, w_dec_ref[...],
                            preferred_element_type=jnp.float32)

    # Row-validity mask (handles batch padding) for the loss partials.
    row = jax.lax.broadcasted_iota(jnp.int32, (tm, 1), 0) + i * tm
    valid = row < batch_total

    # L1 partial: per-lane accumulate (pure VPU adds); the full scalar reduce
    # is deferred to the last hidden tile.
    a = jnp.where(valid, jnp.abs(acts_f32), 0.0)
    if th % 128 == 0:
        lane_part = a[:, 0:128]
        for c in range(1, th // 128):
            lane_part = lane_part + a[:, c * 128:(c + 1) * 128]
    else:
        lane = jax.lax.broadcasted_iota(jnp.int32, (tm, 128), 1)
        lane_part = jnp.where(lane == 0,
                              jnp.sum(a, axis=-1, keepdims=True),
                              jnp.float32(0.0))
    l1_ref[...] += lane_part

    @pl.when(j == nj - 1)
    def _finalize():
        recon = acc_ref[...] + b_dec.astype(jnp.float32)
        recon_ref[...] = recon.astype(recon_ref.dtype)

        diff = jnp.where(valid, recon - x.astype(jnp.float32), 0.0)
        l2_part = jnp.sum(diff * diff)                      # once per batch tile
        l1_part = jnp.float32(l1_coeff) * jnp.sum(l1_ref[...])

        # Lane-dense (1, 8, 128) partials row: sublane 0 = l2, sublane 1 = l1.
        sub = jax.lax.broadcasted_iota(jnp.int32, (1, 8, 128), 1)
        part_ref[...] = jnp.where(sub == 0, l2_part,
                        jnp.where(sub == 1, l1_part, jnp.float32(0.0)))


# --------------------------------------------------------------------------
# Wrapper
# --------------------------------------------------------------------------
def _physical_vmem_bytes():
    try:
        info = pltpu.get_tpu_info()
        v = getattr(info, "vmem_capacity_bytes", None)
        if v:
            return int(v)
    except Exception:
        pass
    return 64 * 1024 * 1024            # conservative (v7x per-TC); safe on all


def _select_tiles(B, d_mlp, d_hidden, itemsize, acc_in_out, vmem_budget):
    """Pick (tm, th, x_bufs, footprint_bytes) to maximize weight reuse within
    the VMEM budget."""
    row_mult = 16 if itemsize == 2 else 8

    # Hidden tile: lane-dense and as large as possible (512 > 256 > 128).
    for cand in (512, 256, 128):
        if d_hidden % cand == 0:
            th = cand
            break
    else:
        th = d_hidden                  # full-extent block (always legal)

    f32 = 4

    def footprint(tm, x_bufs):
        fp = (x_bufs * tm * d_mlp * itemsize            # x block(s)
              + 2 * d_mlp * th * itemsize               # W_enc (double-buffered)
              + 2 * th * d_mlp * itemsize               # W_dec (double-buffered)
              + 2 * _round_up(th, 128) * itemsize       # b_enc
              + x_bufs * d_mlp * itemsize               # b_dec
              + 2 * tm * d_mlp * itemsize               # recon out
              + 2 * tm * th * itemsize                  # acts out
              + 2 * 8 * 128 * f32                       # loss partials out
              + tm * 128 * f32)                         # l1 lane accumulator
        if not acc_in_out:
            fp += tm * d_mlp * f32                      # fp32 recon accumulator
        return fp

    if B <= 128:
        cands = [_round_up(B, row_mult)]
    else:
        # Keep >= 2 batch tiles so the parallel axis can shard across the two
        # v7x TensorCores; otherwise go as big as VMEM allows (weight reuse).
        half = _round_up(-(-B // 2), row_mult)
        cands = sorted({min(c, half) for c in (512, 384, 256, 128)},
                       reverse=True)

    for x_bufs in (2, 1):              # fall back to single-buffered residents
        for tm in cands:
            if footprint(tm, x_bufs) <= vmem_budget:
                return tm, th, x_bufs, footprint(tm, x_bufs)

    tm = cands[-1]
    return tm, th, 1, footprint(tm, 1)


def autoencoder_forward(x, w_enc, w_dec, b_enc, b_dec, l1_coeff):
    """x: (B, d_mlp). Returns (loss, x_reconstruct, acts, l2_loss, l1_loss)."""
    B, d_mlp = x.shape
    d_hidden = w_enc.shape[1]
    dtype = x.dtype
    itemsize = jnp.dtype(dtype).itemsize
    acc_in_out = dtype == jnp.float32   # fp32 output doubles as accumulator

    phys_vmem = _physical_vmem_bytes()
    budget = int(phys_vmem * 0.55)

    tm, th, x_bufs, fp_bytes = _select_tiles(B, d_mlp, d_hidden, itemsize,
                                             acc_in_out, budget)
    B_pad = _round_up(B, tm)
    num_bt = B_pad // tm
    nj = d_hidden // th

    x_in = jnp.pad(x, ((0, B_pad - B), (0, 0))) if B_pad != B else x

    kernel = functools.partial(
        _sae_kernel, l1_coeff=float(l1_coeff), batch_total=B,
        tm=tm, th=th, acc_in_out=acc_in_out)

    scratch_shapes = []
    if not acc_in_out:
        scratch_shapes.append(pltpu.VMEM((tm, d_mlp), jnp.float32))  # recon acc
    scratch_shapes.append(pltpu.VMEM((tm, 128), jnp.float32))        # l1 lanes

    # Blocks resident over the hidden axis: single-buffer only if VMEM-tight.
    resident_kw = dict(pipeline_mode=pl.Buffered(1)) if x_bufs == 1 else {}

    in_specs = [
        pl.BlockSpec((tm, d_mlp), lambda i, j: (i, 0), **resident_kw),  # x
        pl.BlockSpec((d_mlp, th), lambda i, j: (0, j)),                 # W_enc
        pl.BlockSpec((th, d_mlp), lambda i, j: (j, 0)),                 # W_dec
        pl.BlockSpec((1, th),     lambda i, j: (0, j)),                 # b_enc
        pl.BlockSpec((1, d_mlp),  lambda i, j: (0, 0), **resident_kw),  # b_dec
    ]
    out_specs = (
        pl.BlockSpec((tm, d_mlp),  lambda i, j: (i, 0)),     # recon (resident)
        pl.BlockSpec((tm, th),     lambda i, j: (i, j)),     # acts
        pl.BlockSpec((1, 8, 128),  lambda i, j: (i, 0, 0)),  # loss partials
    )

    w_itemsize = jnp.dtype(w_enc.dtype).itemsize
    cost = pl.CostEstimate(
        flops=4 * B_pad * d_mlp * d_hidden,
        transcendentals=0,
        bytes_accessed=int(
            num_bt * (2 * d_mlp * d_hidden + d_hidden + d_mlp) * w_itemsize
            + 2 * B_pad * d_mlp * itemsize       # x in + recon out
            + B_pad * d_hidden * itemsize        # acts out
            + num_bt * 8 * 128 * 4))             # partials out

    vmem_limit = int(min(int(phys_vmem * 0.8),
                         max(fp_bytes + (8 << 20), 32 << 20)))

    recon, acts, partials = pl.pallas_call(
        kernel,
        out_shape=(
            jax.ShapeDtypeStruct((B_pad, d_mlp), dtype),          # x_reconstruct
            jax.ShapeDtypeStruct((B_pad, d_hidden), dtype),       # acts
            jax.ShapeDtypeStruct((num_bt, 8, 128), jnp.float32),  # loss partials
        ),
        grid_spec=pltpu.PrefetchScalarGridSpec(
            num_scalar_prefetch=0,
            grid=(num_bt, nj),
            in_specs=in_specs,
            out_specs=out_specs,
            scratch_shapes=scratch_shapes,
        ),
        compiler_params=pltpu.CompilerParams(
            dimension_semantics=("parallel", "arbitrary"),
            vmem_limit_bytes=vmem_limit,
        ),
        cost_estimate=cost,
    )(x_in, w_enc, w_dec, b_enc.reshape(1, -1), b_dec.reshape(1, -1))

    l2_loss = jnp.sum(partials[:, 0, 0]) / jnp.float32(B)   # mean over full batch
    l1_loss = jnp.sum(partials[:, 1, 0])
    loss = l2_loss + l1_loss
    return loss, recon[:B], acts[:B], l2_loss, l1_loss


# --------------------------------------------------------------------------
# Params / reference / self-test
# --------------------------------------------------------------------------
def init_params(key, d_mlp, d_hidden, dtype=jnp.float32):
    """Mirror of the PyTorch __init__: kaiming-uniform W_enc/W_dec, zero
    biases, W_dec row-normalized."""
    k1, k2 = jax.random.split(key)
    bound_enc = jnp.sqrt(6.0 / d_hidden)   # fan_in = W_enc.size(1)
    bound_dec = jnp.sqrt(6.0 / d_mlp)      # fan_in = W_dec.size(1)
    w_enc = jax.random.uniform(k1, (d_mlp, d_hidden), jnp.float32,
                               -bound_enc, bound_enc).astype(dtype)
    w_dec = jax.random.uniform(k2, (d_hidden, d_mlp), jnp.float32,
                               -bound_dec, bound_dec).astype(dtype)
    w_dec = (w_dec / jnp.linalg.norm(w_dec.astype(jnp.float32),
                                     axis=-1, keepdims=True)).astype(dtype)
    b_enc = jnp.zeros((d_hidden,), dtype)
    b_dec = jnp.zeros((d_mlp,), dtype)
    return w_enc, w_dec, b_enc, b_dec


def _reference_forward(x, w_enc, w_dec, b_enc, b_dec, l1_coeff):
    hp = jax.lax.Precision.HIGHEST
    x = x.astype(jnp.float32)
    x_cent = x - b_dec.astype(jnp.float32)
    acts = jax.nn.relu(jnp.dot(x_cent, w_enc.astype(jnp.float32), precision=hp)
                       + b_enc.astype(jnp.float32))
    recon = jnp.dot(acts, w_dec.astype(jnp.float32), precision=hp) \
        + b_dec.astype(jnp.float32)
    l2 = jnp.mean(jnp.sum((recon - x) ** 2, axis=-1))
    l1 = l1_coeff * jnp.sum(jnp.abs(acts))
    return l2 + l1, recon, acts, l2, l1


def _run_case(batch, d_mlp, dict_mult, seed, l1_coeff=3e-4):
    d_hidden = d_mlp * dict_mult
    key = jax.random.PRNGKey(seed)
    kx, kp = jax.random.split(key)
    w_enc, w_dec, b_enc, b_dec = init_params(kp, d_mlp, d_hidden, jnp.float32)
    x = jax.random.normal(kx, (batch, d_mlp), jnp.float32)

    loss, recon, acts, l2_loss, l1_loss = jax.block_until_ready(
        autoencoder_forward(x, w_enc, w_dec, b_enc, b_dec, l1_coeff))

    loss_r, recon_r, acts_r, l2_r, l1_r = _reference_forward(
        x, w_enc, w_dec, b_enc, b_dec, l1_coeff)

    assert recon.shape == (batch, d_mlp) and acts.shape == (batch, d_hidden)
    assert bool(jnp.allclose(recon, recon_r, atol=2e-3, rtol=2e-3)), "recon mismatch"
    assert bool(jnp.allclose(acts, acts_r, atol=2e-3, rtol=2e-3)), "acts mismatch"
    assert bool(jnp.allclose(l2_loss, l2_r, atol=5e-2, rtol=5e-3)), "l2 mismatch"
    assert bool(jnp.allclose(l1_loss, l1_r, atol=1e-2, rtol=5e-3)), "l1 mismatch"
    assert bool(jnp.allclose(loss, loss_r, atol=5e-2, rtol=5e-3)), "loss mismatch"


if __name__ == "__main__":
    # Case 1 (small): d_mlp=128, dict_mult=2 -> d_hidden=256, single tile each way.
    _run_case(batch=64, d_mlp=128, dict_mult=2, seed=0)
    # Case 2: exercises 2 batch tiles (parallel axis), 3 hidden tiles
    # (reduction axis) and batch padding/masking (B=300 -> B_pad=304).
    _run_case(batch=300, d_mlp=128, dict_mult=3, seed=0)
    print("KERNEL_OK")
</pallas_src>

<mosaic_0001>
module attributes {stable_mosaic.version = 11 : i64} {
  func.func @_sae_kernel(%arg0: i32, %arg1: i32, %arg2: memref<64x128xf32, #tpu.memory_space<vmem>>, %arg3: memref<128x256xf32, #tpu.memory_space<vmem>>, %arg4: memref<256x128xf32, #tpu.memory_space<vmem>>, %arg5: memref<1x256xf32, #tpu.memory_space<vmem>>, %arg6: memref<1x128xf32, #tpu.memory_space<vmem>>, %arg7: memref<64x128xf32, #tpu.memory_space<vmem>>, %arg8: memref<64x256xf32, #tpu.memory_space<vmem>>, %arg9: memref<1x8x128xf32, #tpu.memory_space<vmem>>, %arg10: memref<64x128xf32, #tpu.memory_space<vmem>>) attributes {dimension_semantics = [#tpu.dimension_semantics<parallel>, #tpu.dimension_semantics<arbitrary>], iteration_bounds = array<i64: 1, 1>, scalar_prefetch = 0 : i64, scratch_operands = 1 : i64, tpu.core_type = #tpu.core_type<tc>, window_params = [{transform_indices = @transform_0, window_bounds = array<i64: 64, 128>}, {transform_indices = @transform_1, window_bounds = array<i64: 128, 256>}, {transform_indices = @transform_2, window_bounds = array<i64: 256, 128>}, {transform_indices = @transform_3, window_bounds = array<i64: 1, 256>}, {pipeline_mode = #tpu.pipeline_mode<synchronous>, transform_indices = @transform_4, window_bounds = array<i64: 1, 128>}, {transform_indices = @transform_5, window_bounds = array<i64: 64, 128>}, {transform_indices = @transform_6, window_bounds = array<i64: 64, 256>}, {transform_indices = @transform_7, window_bounds = array<i64: 1, 8, 128>}]} {
    %c0_i32 = arith.constant 0 : i32
    %0 = arith.cmpi eq, %arg1, %c0_i32 : i32
    %1 = arith.extui %0 : i1 to i32
    %c0_i32_0 = arith.constant 0 : i32
    %2 = arith.cmpi ne, %1, %c0_i32_0 : i32
    scf.if %2 {
      %cst_26 = arith.constant 0.000000e+00 : f32
      %40 = vector.broadcast %cst_26 : f32 to vector<64x128xf32>
      %c0_27 = arith.constant 0 : index
      %c0_28 = arith.constant 0 : index
      %41 = vector.load %arg7[%c0_27, %c0_28] : memref<64x128xf32, #tpu.memory_space<vmem>>, vector<64x128xf32>
      tpu.vector_store %arg7[%c0_27, %c0_28], %40 {strides = array<i32>} : memref<64x128xf32, #tpu.memory_space<vmem>>, vector<64x128xf32>,
      %cst_29 = arith.constant 0.000000e+00 : f32
      %42 = vector.broadcast %cst_29 : f32 to vector<64x128xf32>
      %c0_30 = arith.constant 0 : index
      %c0_31 = arith.constant 0 : index
      %43 = vector.load %arg10[%c0_30, %c0_31] : memref<64x128xf32, #tpu.memory_space<vmem>>, vector<64x128xf32>
      tpu.vector_store %arg10[%c0_30, %c0_31], %42 {strides = array<i32>} : memref<64x128xf32, #tpu.memory_space<vmem>>, vector<64x128xf32>,
    } else {
    }
    %c0 = arith.constant 0 : index
    %c0_1 = arith.constant 0 : index
    %3 = vector.load %arg2[%c0, %c0_1] : memref<64x128xf32, #tpu.memory_space<vmem>>, vector<64x128xf32>
    %c0_2 = arith.constant 0 : index
    %c0_3 = arith.constant 0 : index
    %4 = vector.load %arg6[%c0_2, %c0_3] : memref<1x128xf32, #tpu.memory_space<vmem>>, vector<1x128xf32>
    %5 = vector.broadcast %4 : vector<1x128xf32> to vector<64x128xf32>
    %6 = arith.subf %3, %5 : vector<64x128xf32>
    %c0_4 = arith.constant 0 : index
    %c0_5 = arith.constant 0 : index
    %7 = vector.load %arg3[%c0_4, %c0_5] : memref<128x256xf32, #tpu.memory_space<vmem>>, vector<128x256xf32>
    %cst = arith.constant dense<0.000000e+00> : vector<64x256xf32>
    %8 = tpu.matmul %6, %7, %cst {dimension_numbers = #tpu.dot_dimension_numbers<[1], [0], [0], [1], [0, 0, 1, 1], [], []>} : vector<64x128xf32>, vector<128x256xf32>, vector<64x256xf32> -> vector<64x256xf32>
    %c0_6 = arith.constant 0 : index
    %c0_7 = arith.constant 0 : index
    %9 = vector.load %arg5[%c0_6, %c0_7] : memref<1x256xf32, #tpu.memory_space<vmem>>, vector<1x256xf32>
    %10 = vector.broadcast %9 : vector<1x256xf32> to vector<64x256xf32>
    %11 = arith.addf %8, %10 : vector<64x256xf32>
    %cst_8 = arith.constant 0.000000e+00 : f32
    %12 = vector.broadcast %cst_8 : f32 to vector<64x256xf32>
    %13 = arith.maximumf %11, %12 : vector<64x256xf32>
    %c0_9 = arith.constant 0 : index
    %c0_10 = arith.constant 0 : index
    %14 = vector.load %arg8[%c0_9, %c0_10] : memref<64x256xf32, #tpu.memory_space<vmem>>, vector<64x256xf32>
    tpu.vector_store %arg8[%c0_9, %c0_10], %13 {strides = array<i32>} : memref<64x256xf32, #tpu.memory_space<vmem>>, vector<64x256xf32>,
    %c0_11 = arith.constant 0 : index
    %c0_12 = arith.constant 0 : index
    %15 = vector.load %arg7[%c0_11, %c0_12] : memref<64x128xf32, #tpu.memory_space<vmem>>, vector<64x128xf32>
    %c0_13 = arith.constant 0 : index
    %c0_14 = arith.constant 0 : index
    %16 = vector.load %arg4[%c0_13, %c0_14] : memref<256x128xf32, #tpu.memory_space<vmem>>, vector<256x128xf32>
    %cst_15 = arith.constant dense<0.000000e+00> : vector<64x128xf32>
    %17 = tpu.matmul %13, %16, %cst_15 {dimension_numbers = #tpu.dot_dimension_numbers<[1], [0], [0], [1], [0, 0, 1, 1], [], []>} : vector<64x256xf32>, vector<256x128xf32>, vector<64x128xf32> -> vector<64x128xf32>
    %18 = arith.addf %15, %17 : vector<64x128xf32>
    %c0_16 = arith.constant 0 : index
    %c0_17 = arith.constant 0 : index
    %19 = vector.load %arg7[%c0_16, %c0_17] : memref<64x128xf32, #tpu.memory_space<vmem>>, vector<64x128xf32>
    tpu.vector_store %arg7[%c0_16, %c0_17], %18 {strides = array<i32>} : memref<64x128xf32, #tpu.memory_space<vmem>>, vector<64x128xf32>,
    %20 = tpu.iota {dimensions = array<i32: 0>} : vector<64x1xi32>
    %c64_i32 = arith.constant 64 : i32
    %21 = arith.muli %arg0, %c64_i32 : i32
    %22 = vector.broadcast %21 : i32 to vector<64x1xi32>
    %23 = arith.addi %20, %22 : vector<64x1xi32>
    %c64_i32_18 = arith.constant 64 : i32
    %24 = vector.broadcast %c64_i32_18 : i32 to vector<64x1xi32>
    %25 = arith.cmpi slt, %23, %24 : vector<64x1xi32>
    %26 = math.absf %13 : vector<64x256xf32>
    %cst_19 = arith.constant 0.000000e+00 : f32
    %27 = vector.shape_cast %25 : vector<64x1xi1> to vector<64x1xi1>
    %28 = vector.broadcast %27 : vector<64x1xi1> to vector<64x256xi1>
    %29 = vector.broadcast %cst_19 : f32 to vector<64x256xf32>
    %30 = arith.select %28, %26, %29 : vector<64x256xi1>, vector<64x256xf32>
    %31 = vector.extract_strided_slice %30 {offsets = [0, 0], sizes = [64, 128], strides = [1, 1]} : vector<64x256xf32> to vector<64x128xf32>
    %32 = vector.extract_strided_slice %30 {offsets = [0, 128], sizes = [64, 128], strides = [1, 1]} : vector<64x256xf32> to vector<64x128xf32>
    %33 = arith.addf %31, %32 : vector<64x128xf32>
    %c0_20 = arith.constant 0 : index
    %c0_21 = arith.constant 0 : index
    %34 = vector.load %arg10[%c0_20, %c0_21] : memref<64x128xf32, #tpu.memory_space<vmem>>, vector<64x128xf32>
    %35 = arith.addf %34, %33 : vector<64x128xf32>
    %c0_22 = arith.constant 0 : index
    %c0_23 = arith.constant 0 : index
    %36 = vector.load %arg10[%c0_22, %c0_23] : memref<64x128xf32, #tpu.memory_space<vmem>>, vector<64x128xf32>
    tpu.vector_store %arg10[%c0_22, %c0_23], %35 {strides = array<i32>} : memref<64x128xf32, #tpu.memory_space<vmem>>, vector<64x128xf32>,
    %c0_i32_24 = arith.constant 0 : i32
    %37 = arith.cmpi eq, %arg1, %c0_i32_24 : i32
    %38 = arith.extui %37 : i1 to i32
    %c0_i32_25 = arith.constant 0 : i32
    %39 = arith.cmpi ne, %38, %c0_i32_25 : i32
    scf.if %39 {
      %c0_26 = arith.constant 0 : index
      %c0_27 = arith.constant 0 : index
      %40 = vector.load %arg7[%c0_26, %c0_27] : memref<64x128xf32, #tpu.memory_space<vmem>>, vector<64x128xf32>
      %41 = vector.broadcast %4 : vector<1x128xf32> to vector<64x128xf32>
      %42 = arith.addf %40, %41 : vector<64x128xf32>
      %c0_28 = arith.constant 0 : index
      %c0_29 = arith.constant 0 : index
      %43 = vector.load %arg7[%c0_28, %c0_29] : memref<64x128xf32, #tpu.memory_space<vmem>>, vector<64x128xf32>
      tpu.vector_store %arg7[%c0_28, %c0_29], %42 {strides = array<i32>} : memref<64x128xf32, #tpu.memory_space<vmem>>, vector<64x128xf32>,
      %44 = arith.subf %42, %3 : vector<64x128xf32>
      %cst_30 = arith.constant 0.000000e+00 : f32
      %45 = vector.shape_cast %25 : vector<64x1xi1> to vector<64x1xi1>
      %46 = vector.broadcast %45 : vector<64x1xi1> to vector<64x128xi1>
      %47 = vector.broadcast %cst_30 : f32 to vector<64x128xf32>
      %48 = arith.select %46, %44, %47 : vector<64x128xi1>, vector<64x128xf32>
      %49 = arith.mulf %48, %48 : vector<64x128xf32>
      %50 = vector.shape_cast %49 : vector<64x128xf32> to vector<1x64x128xf32>
      %cst_31 = arith.constant dense<0.000000e+00> : vector<1xf32>
      %51 = vector.multi_reduction <add>, %50, %cst_31 [1, 2] : vector<1x64x128xf32> to vector<1xf32>
      %52 = vector.shape_cast %51 : vector<1xf32> to vector<1x1x1xf32>
      %53 = vector.extract %52[0, 0, 0] : f32 from vector<1x1x1xf32>
      %c0_32 = arith.constant 0 : index
      %c0_33 = arith.constant 0 : index
      %54 = vector.load %arg10[%c0_32, %c0_33] : memref<64x128xf32, #tpu.memory_space<vmem>>, vector<64x128xf32>
      %55 = vector.shape_cast %54 : vector<64x128xf32> to vector<1x64x128xf32>
      %cst_34 = arith.constant dense<0.000000e+00> : vector<1xf32>
      %56 = vector.multi_reduction <add>, %55, %cst_34 [1, 2] : vector<1x64x128xf32> to vector<1xf32>
      %57 = vector.shape_cast %56 : vector<1xf32> to vector<1x1x1xf32>
      %58 = vector.extract %57[0, 0, 0] : f32 from vector<1x1x1xf32>
      %cst_35 = arith.constant 3.000000e-04 : f32
      %59 = arith.mulf %cst_35, %58 : f32
      %60 = tpu.iota {dimensions = array<i32: 1>} : vector<1x8x128xi32>
      %c0_i32_36 = arith.constant 0 : i32
      %61 = vector.broadcast %c0_i32_36 : i32 to vector<1x8x128xi32>
      %62 = arith.cmpi eq, %60, %61 : vector<1x8x128xi32>
      %c1_i32 = arith.constant 1 : i32
      %63 = vector.broadcast %c1_i32 : i32 to vector<1x8x128xi32>
      %64 = arith.cmpi eq, %60, %63 : vector<1x8x128xi32>
      %cst_37 = arith.constant 0.000000e+00 : f32
      %65 = vector.broadcast %59 : f32 to vector<1x8x128xf32>
      %66 = vector.broadcast %cst_37 : f32 to vector<1x8x128xf32>
      %67 = arith.select %64, %65, %66 : vector<1x8x128xi1>, vector<1x8x128xf32>
      %68 = vector.broadcast %53 : f32 to vector<1x8x128xf32>
      %69 = arith.select %62, %68, %67 : vector<1x8x128xi1>, vector<1x8x128xf32>
      %c0_38 = arith.constant 0 : index
      %c0_39 = arith.constant 0 : index
      %c0_40 = arith.constant 0 : index
      %70 = vector.load %arg9[%c0_38, %c0_39, %c0_40] : memref<1x8x128xf32, #tpu.memory_space<vmem>>, vector<1x8x128xf32>
      tpu.vector_store %arg9[%c0_38, %c0_39, %c0_40], %69 {strides = array<i32>} : memref<1x8x128xf32, #tpu.memory_space<vmem>>, vector<1x8x128xf32>,
    } else {
    }
    return
  }
  func.func @transform_0(%arg0: i32, %arg1: i32) -> (i32, i32) {
    %c0_i32 = arith.constant 0 : i32
    %c0_i32_0 = arith.constant 0 : i32
    return %arg0, %c0_i32 : i32, i32
  }
  func.func @transform_1(%arg0: i32, %arg1: i32) -> (i32, i32) {
    %c0_i32 = arith.constant 0 : i32
    %c0_i32_0 = arith.constant 0 : i32
    return %c0_i32, %arg1 : i32, i32
  }
  func.func @transform_2(%arg0: i32, %arg1: i32) -> (i32, i32) {
    %c0_i32 = arith.constant 0 : i32
    %c0_i32_0 = arith.constant 0 : i32
    return %arg1, %c0_i32 : i32, i32
  }
  func.func @transform_3(%arg0: i32, %arg1: i32) -> (i32, i32) {
    %c0_i32 = arith.constant 0 : i32
    %c0_i32_0 = arith.constant 0 : i32
    return %c0_i32, %arg1 : i32, i32
  }
  func.func @transform_4(%arg0: i32, %arg1: i32) -> (i32, i32) {
    %c0_i32 = arith.constant 0 : i32
    %c0_i32_0 = arith.constant 0 : i32
    %c0_i32_1 = arith.constant 0 : i32
    return %c0_i32, %c0_i32_0 : i32, i32
  }
  func.func @transform_5(%arg0: i32, %arg1: i32) -> (i32, i32) {
    %c0_i32 = arith.constant 0 : i32
    %c0_i32_0 = arith.constant 0 : i32
    return %arg0, %c0_i32 : i32, i32
  }
  func.func @transform_6(%arg0: i32, %arg1: i32) -> (i32, i32) {
    %c0_i32 = arith.constant 0 : i32
    return %arg0, %arg1 : i32, i32
  }
  func.func @transform_7(%arg0: i32, %arg1: i32) -> (i32, i32, i32) {
    %c0_i32 = arith.constant 0 : i32
    %c0_i32_0 = arith.constant 0 : i32
    %c0_i32_1 = arith.constant 0 : i32
    return %arg0, %c0_i32, %c0_i32_0 : i32, i32, i32
  }
}

</mosaic_0001>

<bundles_post_ra>
// kernel: tpu_custom_call.1
= control target key start
LH: loop header
LB: loop body
LE: loop exit
PB: predicated region body
PF: predicated region fallthrough
CT: control target
= control target key end

     0   :  { %13 = vsyncpa [#allocation4], 0  ;;  %s1089_s0 = inlined_call_operand.hbm [shape: f32[64,128], index: 0, kind: input, shape index: {}]   ;;  %s1090_s1 = inlined_call_operand.hbm [shape: f32[128,256], index: 1, kind: input, shape index: {}]   ;;  %s1091_s2 = inlined_call_operand.hbm [shape: f32[256,128], index: 2, kind: input, shape index: {}]   ;;  %s1092_s3 = inlined_call_operand.vmem [shape: f32[1,256], index: 3, kind: input, shape index: {}]   ;;  %s1093_s4 = inlined_call_operand.vmem [shape: f32[1,128], index: 4, kind: input, shape index: {}]   ;;  %s1094_s5 = inlined_call_operand.hbm [shape: f32[64,128], index: 5, kind: output, shape index: {0}]   ;;  %s1095_s6 = inlined_call_operand.hbm [shape: f32[64,256], index: 6, kind: output, shape index: {1}]   ;;  %s1096_s7 = inlined_call_operand.hbm [shape: f32[1,8,128], index: 7, kind: output, shape index: {2}]  }
   0x1   :  { %14 = vsyncpa [#allocation7], 0 }
   0x2   :  { %15 = vsyncpa [#allocation5], 0 }
   0x3   :  { %16 = vsyncpa [#allocation11], 0  ;;  %s912_s24 = smov [#allocation6]  }
   0x4   :  { %s34_s25 = sshll.u32 %s912_s24, 4  ;;  %s35_s25 = int_to_ptr.vmem [resolvable:$true] %s34_s25 }
   0x5   :  { %s792_s26 = scalar_lea.vmem %s35_s25, 4096  ;;  %p797_p1 = scmp.lt.s32.totalorder %s35_s25, %s35_s25 }
   0x6   :  { %p793_p0 = scmp.ne.s32.totalorder %s35_s25, %s792_s26  ;;  %p798_p2 = scmp.lt.s32.totalorder %s792_s26, %s792_s26 }
   0x8   :  { %p799_p3 = por %p798_p2, %p797_p1 }
   0xa   :  { %p800_p4 = pnand %p799_p3, %p793_p0 }
   0xc   :  { %803 = shalt.err (!%p800_p4)
}
   0xd   :  { %s913_s27 = smov 256   ;;  %s914_s28 = smov 16  }
   0xe   :  { %40 = dma.hbm_to_vmem [thread:$0]  %s1090_s1, 4096, %s35_s25, [#allocation7], %s913_s27, %s913_s27, %s914_s28  }
   0xf   :  { %s915_s8 = smov [#allocation3]  }
  0x10   :  { %s22_s9 = sshll.u32 %s915_s8, 4  ;;  %s23_s9 = int_to_ptr.vmem [resolvable:$true] %s22_s9 }
  0x11   :  { %s812_s10 = scalar_lea.vmem %s23_s9, 1024  ;;  %p817_p6 = scmp.lt.s32.totalorder %s23_s9, %s23_s9 }
  0x12   :  { %p813_p5 = scmp.ne.s32.totalorder %s23_s9, %s812_s10  ;;  %p818_p7 = scmp.lt.s32.totalorder %s812_s10, %s812_s10 }
  0x14   :  { %p819_p8 = por %p818_p7, %p817_p6 }
  0x16   :  { %p820_p9 = pnand %p819_p8, %p813_p5 }
  0x18   :  { %823 = shalt.err (!%p820_p9)
}
  0x19   :  { %s916_s11 = smov 128   ;;  %s917_s12 = smov 8  }
  0x1a   :  { %28 = dma.hbm_to_vmem [thread:$0]  %s1089_s0, 1024, %s23_s9, [#allocation4], %s916_s11, %s916_s11, %s917_s12  }
  0x1b   :  { %s918_s1 = smov [#allocation8]  }
  0x1c   :  { %s46_s15 = sshll.u32 %s918_s1, 4  ;;  %s47_s15 = int_to_ptr.vmem [resolvable:$true] %s46_s15 }
  0x1d   :  { %s832_s16 = scalar_lea.vmem %s47_s15, 4096  ;;  %p837_p11 = scmp.lt.s32.totalorder %s47_s15, %s47_s15 }
  0x1e   :  { %p833_p10 = scmp.ne.s32.totalorder %s47_s15, %s832_s16  ;;  %p838_p12 = scmp.lt.s32.totalorder %s832_s16, %s832_s16 }
  0x20   :  { %p839_p13 = por %p838_p12, %p837_p11 }
  0x22   :  { %p840_p0 = pnand %p839_p13, %p833_p10 }
  0x24   :  { %843 = shalt.err (!%p840_p0)
}
  0x25   :  { %52 = dma.hbm_to_vmem [thread:$0]  %s1091_s2, 4096, %s47_s15, [#allocation7], %s916_s11, %s916_s11, %s917_s12  }
  0x26   :  { %904 = dma.done.wait [#allocation4], 1024  }
  0x27   :  { %905 = vsyncadd [#allocation4], 4294966272 }
  0x28   :  { %906 = dma.done.wait [#allocation7], 8192  }
  0x29   :  { %907 = vsyncadd [#allocation7], 4294959104  ;;  %v919_v0 = vmov 0.0   ;;  %v140_v1 = vld [vmem:[#allocation6 + $0xf8] sm:$0xff]  ;;  %v139_v2 = vld [vmem:[#allocation6 + $0xf0] sm:$0xff]  ;;  %s921_s21 = smov [#allocation9]  }
  0x2a   :  { %217 = vmatprep.mubr.f32.mxu0 %v919_v0  ;;  %v138_v3 = vld [vmem:[#allocation6 + $0xe8] sm:$0xff]  ;;  %153 = vmatprep.subr.mxu0 %v140_v1  ;;  %v137_v4 = vld [vmem:[#allocation6 + $0xe0] sm:$0xff]  ;;  %v136_v5 = vld [vmem:[#allocation6 + $0xd8] sm:$0xff]  ;;  %s670_s22 = sshll.u32 %s921_s21, 4  ;;  %s671_s22 = int_to_ptr.vmem [resolvable:$true] %s670_s22 }
  0x2b   :  { %154 = vmatpush1.msra.mxu0 %v139_v2  ;;  %v135_v6 = vld [vmem:[#allocation6 + $0xd0] sm:$0xff]  ;;  %v134_v7 = vld [vmem:[#allocation6 + $0xc8] sm:$0xff]  ;;  %v133_v8 = vld [vmem:[#allocation6 + $0xc0] sm:$0xff] }
  0x2c   :  { %155 = vmatprep.subr.mxu0 %v138_v3  ;;  %v132_v9 = vld [vmem:[#allocation6 + $0xb8] sm:$0xff]  ;;  %v131_v10 = vld [vmem:[#allocation6 + $0xb0] sm:$0xff]  ;;  %v130_v11 = vld [vmem:[#allocation6 + $0xa8] sm:$0xff] }
  0x2d   :  { %156 = vmatpush1.msra.mxu0 %v137_v4  ;;  %v129_v12 = vld [vmem:[#allocation6 + $0xa0] sm:$0xff]  ;;  %v128_v13 = vld [vmem:[#allocation6 + $0x98] sm:$0xff]  ;;  %v127_v14 = vld [vmem:[#allocation6 + $0x90] sm:$0xff] }
  0x2e   :  { %157 = vmatprep.subr.mxu0 %v136_v5  ;;  %v126_v15 = vld [vmem:[#allocation6 + $0x88] sm:$0xff]  ;;  %v125_v16 = vld [vmem:[#allocation6 + $0x80] sm:$0xff]  ;;  %v124_v17 = vld [vmem:[#allocation6 + $0x78] sm:$0xff] }
  0x2f   :  { %158 = vmatpush1.msra.mxu0 %v135_v6  ;;  %v337_v18 = vld [vmem:[#allocation8 + $0xf8] sm:$0xff]  ;;  %v336_v20 = vld [vmem:[#allocation8 + $0xf0] sm:$0xff]  ;;  %v335_v23 = vld [vmem:[#allocation8 + $0xe8] sm:$0xff] }
  0x30   :  { %159 = vmatprep.subr.mxu0 %v134_v7  ;;  %713 = vmatprep.subr.mxu1 %v337_v18  ;;  %v321_v19 = vld [vmem:[#allocation8 + $0x78] sm:$0xff]  ;;  %v320_v21 = vld [vmem:[#allocation8 + $0x70] sm:$0xff]  ;;  %v122_v24 = vld [vmem:[#allocation6 + $0x68] sm:$0xff] }
  0x31   :  { %160 = vmatpush1.msra.mxu0 %v133_v8  ;;  %v123_v22 = vld [vmem:[#allocation6 + $0x70] sm:$0xff]  ;;  %714 = vmatpush3.msra.mxu1 %v321_v19  ;;  %v319_v25 = vld [vmem:[#allocation8 + $0x68] sm:$0xff]  ;;  %v121_v26 = vld [vmem:[#allocation6 + $0x60] sm:$0xff]  ;;  %v143_v19 = vlaneseq }
  0x32   :  { %161 = vmatprep.subr.mxu0 %v132_v9  ;;  %715 = vmatprep.subr.mxu1 %v336_v20  ;;  %v334_v27 = vld [vmem:[#allocation8 + $0xe0] sm:$0xff]  ;;  %v120_v28 = vld [vmem:[#allocation6 + $0x58] sm:$0xff]  ;;  %v119_v30 = vld [vmem:[#allocation6 + $0x50] sm:$0xff] }
  0x33   :  { %162 = vmatpush1.msra.mxu0 %v131_v10  ;;  %716 = vmatpush3.msra.mxu1 %v320_v21  ;;  %v318_v29 = vld [vmem:[#allocation8 + $0x60] sm:$0xff]  ;;  %v333_v31 = vld [vmem:[#allocation8 + $0xd8] sm:$0xff]  ;;  %v118_v32 = vld [vmem:[#allocation6 + $0x48] sm:$0xff]  ;;  %v1026_v20 = vshrl.u32 %v143_v19, 7 }
  0x34   :  { %163 = vmatprep.subr.mxu0 %v130_v11  ;;  %717 = vmatprep.subr.mxu1 %v335_v23  ;;  %v317_v33 = vld [vmem:[#allocation8 + $0x58] sm:$0xff]  ;;  %v117_v34 = vld [vmem:[#allocation6 + $0x40] sm:$0xff]  ;;  %v332_v35 = vld [vmem:[#allocation8 + $0xd0] sm:$0xff] }
  0x35   :  { %164 = vmatpush1.msra.mxu0 %v129_v12  ;;  %718 = vmatpush3.msra.mxu1 %v319_v25  ;;  %v116_v36 = vld [vmem:[#allocation6 + $0x38] sm:$0xff]  ;;  %v316_v37 = vld [vmem:[#allocation8 + $0x50] sm:$0xff]  ;;  %v331_v39 = vld [vmem:[#allocation8 + $0xc8] sm:$0xff] }
  0x36   :  { %165 = vmatprep.subr.mxu0 %v128_v13  ;;  %719 = vmatprep.subr.mxu1 %v334_v27  ;;  %v115_v38 = vld [vmem:[#allocation6 + $0x30] sm:$0xff]  ;;  %v114_v40 = vld [vmem:[#allocation6 + $0x28] sm:$0xff]  ;;  %v113_v42 = vld [vmem:[#allocation6 + $0x20] sm:$0xff] }
  0x37   :  { %166 = vmatpush1.msra.mxu0 %v127_v14  ;;  %720 = vmatpush3.msra.mxu1 %v318_v29  ;;  %v315_v41 = vld [vmem:[#allocation8 + $0x48] sm:$0xff]  ;;  %v112_v43 = vld [vmem:[#allocation6 + $0x18] sm:$0xff]  ;;  %v330_v44 = vld [vmem:[#allocation8 + $0xc0] sm:$0xff] }
  0x38   :  { %167 = vmatprep.subr.mxu0 %v126_v15  ;;  %721 = vmatprep.subr.mxu1 %v333_v31  ;;  %v982_v45 = vld [vmem:[#allocation3] sm:$0xff]  ;;  %v111_v48 = vld [vmem:[#allocation6 + $0x10] sm:$0xff]  ;;  %v329_v49 = vld [vmem:[#allocation8 + $0xb8] sm:$0xff] }
  0x39   :  { %168 = vmatpush1.msra.mxu0 %v125_v16  ;;  %722 = vmatpush3.msra.mxu1 %v317_v33  ;;  %v987_v46 = vld [vmem:[%s1093_s4] ss:$0 sm:$0xff]  ;;  %v110_v50 = vld [vmem:[#allocation6 + $0x8] sm:$0xff]  ;;  %v313_v51 = vld [vmem:[#allocation8 + $0x38] sm:$0xff] }
  0x3a   :  { %169 = vmatprep.subr.mxu0 %v124_v17  ;;  %723 = vmatprep.subr.mxu1 %v332_v35  ;;  %v314_v47 = vld [vmem:[#allocation8 + $0x40] sm:$0xff]  ;;  %v101_v53 = vsub.f32 %v982_v45, %v987_v46  ;;  %v328_v54 = vld [vmem:[#allocation8 + $0xb0] sm:$0xff]  ;;  %v991_v55 = vld [vmem:[#allocation3 + $0x8] sm:$0xff] }
  0x3b   :  { %170 = vmatpush1.msra.mxu0 %v123_v22  ;;  %724 = vmatpush3.msra.mxu1 %v316_v37  ;;  %v109_v52 = vld [vmem:[#allocation6] sm:$0xff]  ;;  %v312_v56 = vld [vmem:[#allocation8 + $0x30] sm:$0xff]  ;;  %v327_v57 = vld [vmem:[#allocation8 + $0xa8] sm:$0xff]  ;;  %v102_v59 = vsub.f32 %v991_v55, %v987_v46  ;;  %v149_v22 = vsub.s32 1, %v1026_v20 }
  0x3c   :  { %171 = vmatprep.subr.mxu0 %v122_v24  ;;  %725 = vmatprep.subr.mxu1 %v331_v39  ;;  %v311_v58 = vld [vmem:[#allocation8 + $0x28] sm:$0xff]  ;;  %v326_v60 = vld [vmem:[#allocation8 + $0xa0] sm:$0xff]  ;;  %v996_v61 = vld [vmem:[#allocation3 + $0x10] sm:$0xff] }
  0x3d   :  { %172 = vmatpush1.msra.mxu0 %v121_v26  ;;  %726 = vmatpush3.msra.mxu1 %v315_v41  ;;  %v310_v62 = vld [vmem:[#allocation8 + $0x20] sm:$0xff]  ;;  %v103_v63 = vsub.f32 %v996_v61, %v987_v46  ;;  %v1001_v1 = vld [vmem:[#allocation3 + $0x18] sm:$0xff]  ;;  %v1011_v5 = vld [vmem:[#allocation3 + $0x28] sm:$0xff] }
  0x3e   :  { %173 = vmatprep.subr.mxu0 %v120_v28  ;;  %727 = vmatprep.subr.mxu1 %v330_v44  ;;  %v104_v2 = vsub.f32 %v1001_v1, %v987_v46  ;;  %v1006_v3 = vld [vmem:[#allocation3 + $0x20] sm:$0xff]  ;;  %v106_v6 = vsub.f32 %v1011_v5, %v987_v46  ;;  %v1016_v7 = vld [vmem:[#allocation3 + $0x30] sm:$0xff]  ;;  %v1021_v9 = vld [vmem:[#allocation3 + $0x38] sm:$0xff] }
  0x3f   :  { %174 = vmatpush1.msra.mxu0 %v119_v30  ;;  %728 = vmatpush3.msra.mxu1 %v314_v47  ;;  %v105_v4 = vsub.f32 %v1006_v3, %v987_v46  ;;  %v107_v8 = vsub.f32 %v1016_v7, %v987_v46  ;;  %v108_v10 = vsub.f32 %v1021_v9, %v987_v46  ;;  %v325_v11 = vld [vmem:[#allocation8 + $0x98] sm:$0xff]  ;;  %v324_v13 = vld [vmem:[#allocation8 + $0x90] sm:$0xff]  ;;  %v323_v15 = vld [vmem:[#allocation8 + $0x88] sm:$0xff] }
  0x40   :  { %175 = vmatprep.subr.mxu0 %v118_v32  ;;  %729 = vmatprep.subr.mxu1 %v329_v49  ;;  %v309_v12 = vld [vmem:[#allocation8 + $0x18] sm:$0xff]  ;;  %v308_v14 = vld [vmem:[#allocation8 + $0x10] sm:$0xff]  ;;  %v307_v16 = vld [vmem:[#allocation8 + $0x8] sm:$0xff] }
  0x41   :  { %176 = vmatpush1.msra.mxu0 %v117_v34  ;;  %730 = vmatpush3.msra.mxu1 %v313_v51  ;;  %v322_v17 = vld [vmem:[#allocation8 + $0x80] sm:$0xff] }
  0x42   :  { %177 = vmatprep.subr.mxu0 %v116_v36  ;;  %731 = vmatprep.subr.mxu1 %v328_v54  ;;  %v306_v18 = vld [vmem:[#allocation8] sm:$0xff] }
  0x43   :  { %178 = vmatpush1.msra.mxu0 %v115_v38  ;;  %732 = vmatpush3.msra.mxu1 %v312_v56  ;;  %v141_v21 = vld [vmem:[%s1092_s3] sm:$0x3]  ;;  %s920_s3 = smov [#allocation10]  }
  0x44   :  { %179 = vmatprep.subr.mxu0 %v114_v40  ;;  %733 = vmatprep.subr.mxu1 %v327_v57  ;;  %v1035_v24 = vrot.slane %v141_v21, %v149_v22  ;;  %s682_s20 = sshll.u32 %s920_s3, 4  ;;  %s683_s20 = int_to_ptr.vmem [resolvable:$true] %s682_s20 }
  0x45   :  { %180 = vmatpush1.msra.mxu0 %v113_v42  ;;  %734 = vmatpush3.msra.mxu1 %v311_v58  ;;  %s844_s23 = scalar_lea.vmem %s683_s20, 2048  ;;  %p849_p2 = scmp.lt.s32.totalorder %s683_s20, %s683_s20 }
  0x46   :  { %181 = vmatprep.subr.mxu0 %v112_v43  ;;  %735 = vmatprep.subr.mxu1 %v326_v60  ;;  %p845_p1 = scmp.ne.s32.totalorder %s683_s20, %s844_s23  ;;  %p850_p3 = scmp.lt.s32.totalorder %s844_s23, %s844_s23 }
  0x47   :  { %182 = vmatpush1.msra.mxu0 %v111_v48  ;;  %736 = vmatpush3.msra.mxu1 %v310_v62 }
  0x48   :  { %183 = vmatprep.subr.mxu0 %v110_v50  ;;  %737 = vmatprep.subr.mxu1 %v325_v11  ;;  %p851_p4 = por %p850_p3, %p849_p2 }
  0x49   :  { %184 = vmatpush1.msra.mxu0 %v109_v52  ;;  %738 = vmatpush3.msra.mxu1 %v309_v12 }
  0x4a   :  { %218 = vmatmul.mubr.f32.vlgmr.msra.gmra.mxu0 %v101_v53  ;;  %739 = vmatprep.subr.mxu1 %v324_v13  ;;  %p852_p5 = pnand %p851_p4, %p845_p1 }
  0x4b   :  { %223 = vmatprep.mubr.f32.mxu0 %v919_v0  ;;  %740 = vmatpush3.msra.mxu1 %v308_v14 }
  0x4c   :  { %741 = vmatprep.subr.mxu1 %v323_v15 }
  0x4d   :  { %742 = vmatpush3.msra.mxu1 %v307_v16 }
  0x4e   :  { %224 = vmatmul.mubr.f32.gmra.mxu0 %v102_v59  ;;  %743 = vmatprep.subr.mxu1 %v322_v17 }
  0x4f   :  { %229 = vmatprep.mubr.f32.mxu0 %v919_v0  ;;  %744 = vmatpush3.msra.mxu1 %v306_v18 }
  0x52   :  { %230 = vmatmul.mubr.f32.gmra.mxu0 %v103_v63 }
  0x53   :  { %235 = vmatprep.mubr.f32.mxu0 %v919_v0 }
  0x56   :  { %236 = vmatmul.mubr.f32.gmra.mxu0 %v104_v2 }
  0x57   :  { %241 = vmatprep.mubr.f32.mxu0 %v919_v0 }
  0x5a   :  { %242 = vmatmul.mubr.f32.gmra.mxu0 %v105_v4 }
  0x5b   :  { %247 = vmatprep.mubr.f32.mxu0 %v919_v0 }
  0x5e   :  { %248 = vmatmul.mubr.f32.gmra.mxu0 %v106_v6 }
  0x5f   :  { %253 = vmatprep.mubr.f32.mxu0 %v919_v0 }
  0x62   :  { %254 = vmatmul.mubr.f32.gmra.mxu0 %v107_v8 }
  0x63   :  { %259 = vmatprep.mubr.f32.mxu0 %v919_v0  ;;  %v145_v0 = vsub.s32 0, %v1026_v20 }
  0x65   :  { %v1033_v23 = vrot.slane %v141_v21, %v145_v0 }
  0x66   :  { %260 = vmatmul.mubr.f32.gmra.mxu0 %v108_v10 }
 0x10a   :  { %v219_v25 = vpop.f32.mrf.mxu0 }
 0x10b   :  { %v220_v26 = vadd.f32 %v219_v25, %v1033_v23 }
 0x10c   :  { %v221_v27 = vpop.f32.mrf.mxu0 }
 0x10d   :  { %v266_v28 = vmax.f32 %v220_v26, 0.0  ;;  %v222_v29 = vadd.f32 %v221_v27, %v1035_v24 }
 0x10e   :  { %v225_v30 = vpop.f32.mrf.mxu0 }
 0x10f   :  { %282 = vst [vmem:[#allocation10] sm:$0xff] %v266_v28  ;;  %v267_v31 = vmax.f32 %v222_v29, 0.0  ;;  %v226_v32 = vadd.f32 %v225_v30, %v1033_v23  ;;  %v486_v34 = vand.u32 2147483647, %v266_v28 }
 0x110   :  { %v227_v33 = vpop.f32.mrf.mxu0 }
 0x111   :  { %283 = vst [vmem:[#allocation10 + $0x8] sm:$0xff] %v267_v31  ;;  %v487_v35 = vand.u32 2147483647, %v267_v31  ;;  %v268_v36 = vmax.f32 %v226_v32, 0.0  ;;  %v228_v37 = vadd.f32 %v227_v33, %v1035_v24  ;;  %402 = vmatprep.mubr.f32.mxu1 %v267_v31 }
 0x112   :  { %v231_v38 = vpop.f32.mrf.mxu0  ;;  %403 = vmatmul.mubr.f32.vlgmr.msra.gmra.mxu1 %v266_v28 }
 0x113   :  { %v534_v39 = vadd.f32 %v487_v35, %v486_v34  ;;  %284 = vst [vmem:[#allocation10 + $0x10] sm:$0xff] %v268_v36  ;;  %v269_v40 = vmax.f32 %v228_v37, 0.0  ;;  %v232_v41 = vadd.f32 %v231_v38, %v1033_v23  ;;  %v488_v43 = vand.u32 2147483647, %v268_v36 }
 0x114   :  { %v233_v42 = vpop.f32.mrf.mxu0 }
 0x115   :  { %285 = vst [vmem:[#allocation10 + $0x18] sm:$0xff] %v269_v40  ;;  %v489_v44 = vand.u32 2147483647, %v269_v40  ;;  %v270_v47 = vmax.f32 %v232_v41, 0.0  ;;  %v234_v48 = vadd.f32 %v233_v42, %v1035_v24  ;;  %407 = vmatprep.mubr.f32.mxu1 %v269_v40 }
 0x116   :  { %v237_v49 = vpop.f32.mrf.mxu0  ;;  %408 = vmatmul.mubr.f32.gmra.mxu1 %v268_v36 }
 0x117   :  { %v535_v50 = vadd.f32 %v489_v44, %v488_v43  ;;  %286 = vst [vmem:[#allocation10 + $0x20] sm:$0xff] %v270_v47  ;;  %v271_v51 = vmax.f32 %v234_v48, 0.0  ;;  %v238_v52 = vadd.f32 %v237_v49, %v1033_v23  ;;  %v490_v53 = vand.u32 2147483647, %v270_v47 }
 0x118   :  { %v239_v54 = vpop.f32.mrf.mxu0 }
 0x119   :  { %v641_v56 = vadd.f32 %v535_v50, %v534_v39  ;;  %287 = vst [vmem:[#allocation10 + $0x28] sm:$0xff] %v271_v51  ;;  %v491_v57 = vand.u32 2147483647, %v271_v51  ;;  %v272_v58 = vmax.f32 %v238_v52, 0.0  ;;  %v240_v59 = vadd.f32 %v239_v54, %v1035_v24  ;;  %412 = vmatprep.mubr.f32.mxu1 %v271_v51 }
 0x11a   :  { %v243_v60 = vpop.f32.mrf.mxu0  ;;  %413 = vmatmul.mubr.f32.gmra.mxu1 %v270_v47 }
 0x11b   :  { %v536_v62 = vadd.f32 %v491_v57, %v490_v53  ;;  %288 = vst [vmem:[#allocation10 + $0x30] sm:$0xff] %v272_v58  ;;  %v273_v63 = vmax.f32 %v240_v59, 0.0  ;;  %v244_v2 = vadd.f32 %v243_v60, %v1033_v23  ;;  %v492_v4 = vand.u32 2147483647, %v272_v58 }
 0x11c   :  { %v245_v6 = vpop.f32.mrf.mxu0 }
 0x11d   :  { %v642_v8 = vadd.f32 %v641_v56, %v536_v62  ;;  %289 = vst [vmem:[#allocation10 + $0x38] sm:$0xff] %v273_v63  ;;  %v493_v10 = vand.u32 2147483647, %v273_v63  ;;  %v274_v11 = vmax.f32 %v244_v2, 0.0  ;;  %v246_v12 = vadd.f32 %v245_v6, %v1035_v24  ;;  %417 = vmatprep.mubr.f32.mxu1 %v273_v63 }
 0x11e   :  { %v249_v13 = vpop.f32.mrf.mxu0  ;;  %418 = vmatmul.mubr.f32.gmra.mxu1 %v272_v58 }
 0x11f   :  { %v537_v14 = vadd.f32 %v493_v10, %v492_v4  ;;  %290 = vst [vmem:[#allocation10 + $0x40] sm:$0xff] %v274_v11  ;;  %v275_v15 = vmax.f32 %v246_v12, 0.0  ;;  %v250_v16 = vadd.f32 %v249_v13, %v1033_v23  ;;  %v494_v17 = vand.u32 2147483647, %v274_v11 }
 0x120   :  { %v251_v18 = vpop.f32.mrf.mxu0 }
 0x121   :  { %291 = vst [vmem:[#allocation10 + $0x48] sm:$0xff] %v275_v15  ;;  %v495_v19 = vand.u32 2147483647, %v275_v15  ;;  %v276_v0 = vmax.f32 %v250_v16, 0.0  ;;  %v252_v21 = vadd.f32 %v251_v18, %v1035_v24  ;;  %422 = vmatprep.mubr.f32.mxu1 %v275_v15  ;;  %v643_v22 = vadd.f32 %v642_v8, %v537_v14 }
 0x122   :  { %v255_v25 = vpop.f32.mrf.mxu0  ;;  %423 = vmatmul.mubr.f32.gmra.mxu1 %v274_v11 }
 0x123   :  { %v538_v26 = vadd.f32 %v495_v19, %v494_v17  ;;  %292 = vst [vmem:[#allocation10 + $0x50] sm:$0xff] %v276_v0  ;;  %v277_v27 = vmax.f32 %v252_v21, 0.0  ;;  %v256_v28 = vadd.f32 %v255_v25, %v1033_v23  ;;  %v496_v29 = vand.u32 2147483647, %v276_v0 }
 0x124   :  { %v257_v30 = vpop.f32.mrf.mxu0 }
 0x125   :  { %293 = vst [vmem:[#allocation10 + $0x58] sm:$0xff] %v277_v27  ;;  %v497_v31 = vand.u32 2147483647, %v277_v27  ;;  %v278_v32 = vmax.f32 %v256_v28, 0.0  ;;  %v258_v33 = vadd.f32 %v257_v30, %v1035_v24  ;;  %427 = vmatprep.mubr.f32.mxu1 %v277_v27  ;;  %v644_v34 = vadd.f32 %v643_v22, %v538_v26 }
 0x126   :  { %v261_v35 = vpop.f32.mrf.mxu0  ;;  %428 = vmatmul.mubr.f32.gmra.mxu1 %v276_v0 }
 0x127   :  { %294 = vst [vmem:[#allocation10 + $0x60] sm:$0xff] %v278_v32  ;;  %v279_v36 = vmax.f32 %v258_v33, 0.0  ;;  %v262_v37 = vadd.f32 %v261_v35, %v1033_v23  ;;  %v539_v38 = vadd.f32 %v497_v31, %v496_v29  ;;  %v498_v39 = vand.u32 2147483647, %v278_v32 }
 0x128   :  { %v263_v40 = vpop.f32.mrf.mxu0 }
 0x129   :  { %295 = vst [vmem:[#allocation10 + $0x68] sm:$0xff] %v279_v36  ;;  %v499_v41 = vand.u32 2147483647, %v279_v36  ;;  %v280_v42 = vmax.f32 %v262_v37, 0.0  ;;  %v264_v43 = vadd.f32 %v263_v40, %v1035_v24  ;;  %432 = vmatprep.mubr.f32.mxu1 %v279_v36  ;;  %v645_v44 = vadd.f32 %v644_v34, %v539_v38 }
 0x12a   :  { %433 = vmatmul.mubr.f32.gmra.mxu1 %v278_v32 }
 0x12b   :  { %296 = vst [vmem:[#allocation10 + $0x70] sm:$0xff] %v280_v42  ;;  %v281_v47 = vmax.f32 %v264_v43, 0.0  ;;  %v540_v48 = vadd.f32 %v499_v41, %v498_v39  ;;  %v500_v49 = vand.u32 2147483647, %v280_v42 }
 0x12d   :  { %297 = vst [vmem:[#allocation10 + $0x78] sm:$0xff] %v281_v47  ;;  %437 = vmatprep.mubr.f32.mxu1 %v281_v47  ;;  %v501_v50 = vand.u32 2147483647, %v281_v47  ;;  %v646_v51 = vadd.f32 %v645_v44, %v540_v48 }
 0x12e   :  { %438 = vmatmul.mubr.f32.gmra.mxu1 %v280_v42 }
 0x12f   :  { %v541_v23 = vadd.f32 %v501_v50, %v500_v49 }
 0x131   :  { %v1053_v52 = vadd.f32 %v646_v51, %v541_v23 }
 0x1d2   :  { %v745_v53 = vpop.f32.mrf.mxu1 }
 0x1d4   :  { %v746_v54 = vpop.f32.mrf.mxu1 }
 0x1d5   :  { %v747_v56 = vadd.f32 %v746_v54, %v745_v53 }
 0x1d6   :  { %v748_v57 = vpop.f32.mrf.mxu1 }
 0x1d7   :  { %v577_v58 = vadd.f32 %v747_v56, %v987_v46 }
 0x1d8   :  { %v749_v24 = vpop.f32.mrf.mxu1 }
 0x1d9   :  { %v750_v59 = vadd.f32 %v749_v24, %v748_v57  ;;  %585 = vst [vmem:[#allocation9] sm:$0xff] %v577_v58  ;;  %v593_v18 = vsub.f32 %v577_v58, %v982_v45 }
 0x1da   :  { %v751_v60 = vpop.f32.mrf.mxu1 }
 0x1db   :  { %v578_v63 = vadd.f32 %v750_v59, %v987_v46  ;;  %v609_v28 = vmul.f32 %v593_v18, %v593_v18 }
 0x1dc   :  { %v752_v62 = vpop.f32.mrf.mxu1 }
 0x1dd   :  { %v753_v2 = vadd.f32 %v752_v62, %v751_v60  ;;  %586 = vst [vmem:[#allocation9 + $0x8] sm:$0xff] %v578_v63  ;;  %v594_v16 = vsub.f32 %v578_v63, %v991_v55 }
 0x1de   :  { %v754_v4 = vpop.f32.mrf.mxu1 }
 0x1df   :  { %v579_v8 = vadd.f32 %v753_v2, %v987_v46  ;;  %v610_v26 = vmul.f32 %v594_v16, %v594_v16 }
 0x1e0   :  { %v755_v6 = vpop.f32.mrf.mxu1 }
 0x1e1   :  { %v756_v10 = vadd.f32 %v755_v6, %v754_v4  ;;  %587 = vst [vmem:[#allocation9 + $0x10] sm:$0xff] %v579_v8  ;;  %v595_v21 = vsub.f32 %v579_v8, %v996_v61  ;;  %v617_v34 = vadd.f32 %v610_v26, %v609_v28 }
 0x1e2   :  { %v757_v11 = vpop.f32.mrf.mxu1 }
 0x1e3   :  { %v580_v13 = vadd.f32 %v756_v10, %v987_v46  ;;  %v611_v31 = vmul.f32 %v595_v21, %v595_v21 }
 0x1e4   :  { %v758_v12 = vpop.f32.mrf.mxu1 }
 0x1e5   :  { %v759_v14 = vadd.f32 %v758_v12, %v757_v11  ;;  %588 = vst [vmem:[#allocation9 + $0x18] sm:$0xff] %v580_v13  ;;  %v596_v25 = vsub.f32 %v580_v13, %v1001_v1  ;;  %v618_v37 = vadd.f32 %v617_v34, %v611_v31 }
 0x1e6   :  { %v760_v15 = vpop.f32.mrf.mxu1 }
 0x1e7   :  { %v581_v0 = vadd.f32 %v759_v14, %v987_v46  ;;  %v612_v33 = vmul.f32 %v596_v25, %v596_v25 }
 0x1e8   :  { %v761_v17 = vpop.f32.mrf.mxu1 }
 0x1e9   :  { %v762_v19 = vadd.f32 %v761_v17, %v760_v15  ;;  %589 = vst [vmem:[#allocation9 + $0x20] sm:$0xff] %v581_v0  ;;  %v597_v55 = vsub.f32 %v581_v0, %v1006_v3  ;;  %v619_v40 = vadd.f32 %v618_v37, %v612_v33 }
 0x1ea   :  { %v763_v22 = vpop.f32.mrf.mxu1 }
 0x1eb   :  { %v582_v30 = vadd.f32 %v762_v19, %v987_v46  ;;  %v613_v1 = vmul.f32 %v597_v55, %v597_v55 }
 0x1ec   :  { %v764_v27 = vpop.f32.mrf.mxu1 }
 0x1ed   :  { %v765_v29 = vadd.f32 %v764_v27, %v763_v22  ;;  %590 = vst [vmem:[#allocation9 + $0x28] sm:$0xff] %v582_v30  ;;  %v598_v45 = vsub.f32 %v582_v30, %v1011_v5  ;;  %v620_v42 = vadd.f32 %v619_v40, %v613_v1 }
 0x1ee   :  { %v766_v32 = vpop.f32.mrf.mxu1 }
 0x1ef   :  { %v583_v36 = vadd.f32 %v765_v29, %v987_v46  ;;  %v614_v39 = vmul.f32 %v598_v45, %v598_v45 }
 0x1f0   :  { %v767_v61 = vpop.f32.mrf.mxu1 }
 0x1f1   :  { %v768_v35 = vadd.f32 %v767_v61, %v766_v32  ;;  %591 = vst [vmem:[#allocation9 + $0x30] sm:$0xff] %v583_v36  ;;  %v599_v38 = vsub.f32 %v583_v36, %v1016_v7  ;;  %v621_v43 = vadd.f32 %v620_v42, %v614_v39 }
 0x1f3   :  { %v584_v3 = vadd.f32 %v768_v35, %v987_v46  ;;  %v615_v41 = vmul.f32 %v599_v38, %v599_v38 }
 0x1f5   :  { %592 = vst [vmem:[#allocation9 + $0x38] sm:$0xff] %v584_v3  ;;  %v600_v5 = vsub.f32 %v584_v3, %v1021_v9  ;;  %v622_v47 = vadd.f32 %v621_v43, %v615_v41 }
 0x1f7   :  { %v616_v44 = vmul.f32 %v600_v5, %v600_v5 }
 0x1f9   :  { %v623_v48 = vadd.f32 %v622_v47, %v616_v44 }
 0x1fb   :  { %624 = vadd.xlane.f32.xlu0 %v623_v48 }
 0x1ff   :  { %648 = vadd.xlane.f32.xlu0 %v1053_v52 }
 0x200   :  { %855 = shalt.err (!%p852_p5)
}
 0x201   :  { %688 = dma.vmem_to_hbm [thread:$0]  %s683_s20, 2048, %s1095_s6, [#allocation11], %s913_s27, %s913_s27, %s914_s28  }
 0x202   :  { %s864_s26 = scalar_lea.vmem %s671_s22, 1024  ;;  %p869_p7 = scmp.lt.s32.totalorder %s671_s22, %s671_s22 }
 0x203   :  { %p865_p6 = scmp.ne.s32.totalorder %s671_s22, %s864_s26  ;;  %p870_p8 = scmp.lt.s32.totalorder %s864_s26, %s864_s26 }
 0x205   :  { %p871_p9 = por %p870_p8, %p869_p7 }
 0x207   :  { %p872_p10 = pnand %p871_p9, %p865_p6 }
 0x209   :  { %875 = shalt.err (!%p872_p10)
}
 0x20a   :  { %676 = dma.vmem_to_hbm [thread:$0]  %s671_s22, 1024, %s1094_s5, [#allocation5], %s916_s11, %s916_s11, %s917_s12   ;;  %vm659_vm0 = vcmp.eq.s32.totalorder %v1026_v20, 1  ;;  %vm658_vm1 = vcmp.eq.s32.totalorder %v1026_v20, 0 }
 0x20b   :  { %s922_s5 = smov [#allocation12]  }
 0x20c   :  { %s695_s8 = sshll.u32 %s922_s5, 4  ;;  %s696_s8 = int_to_ptr.vmem [resolvable:$true] %s695_s8 }
 0x20d   :  { %s884_s9 = scalar_lea.vmem %s696_s8, 128  ;;  %p889_p12 = scmp.lt.s32.totalorder %s696_s8, %s696_s8 }
 0x20e   :  { %p885_p11 = scmp.ne.s32.totalorder %s696_s8, %s884_s9  ;;  %p890_p13 = scmp.lt.s32.totalorder %s884_s9, %s884_s9 }
 0x210   :  { %p891_p0 = por %p890_p13, %p889_p12 }
 0x212   :  { %p892_p1 = pnand %p891_p0, %p885_p11 }
 0x284   :  { %v625_v46 = vpop.xlane.xlu0 %624 }
 0x285   :  { %v626_v7 = vrot.slane %v625_v46, 4 }
 0x287   :  { %v627_v9 = vadd.f32 %v626_v7, %v625_v46 }
 0x288   :  { %v649_v49 = vpop.xlane.xlu0 %648 }
 0x289   :  { %v628_v50 = vrot.slane %v627_v9, 2  ;;  %v650_v51 = vrot.slane %v649_v49, 4 }
 0x28b   :  { %v651_v23 = vadd.f32 %v650_v51, %v649_v49  ;;  %v629_v52 = vadd.f32 %v628_v50, %v627_v9 }
 0x28d   :  { %v652_v53 = vrot.slane %v651_v23, 2  ;;  %v630_v54 = vrot.slane %v629_v52, 1 }
 0x28f   :  { %v653_v56 = vadd.f32 %v652_v53, %v651_v23  ;;  %v631_v57 = vadd.f32 %v630_v54, %v629_v52 }
 0x291   :  { %769 = vpush %v631_v57  ;;  %v654_v24 = vrot.slane %v653_v56, 1 }
 0x293   :  { %v655_v58 = vadd.f32 %v654_v24, %v653_v56 }
 0x295   :  { %771 = vpush %v655_v58 }
 0x2c2   :  { %s770_s6 = spop %769 }
 0x2c3   :  { %v662_v60 = vstv %s770_s6 }
 0x2c6   :  { %s772_s27 = spop %771 }
 0x2c7   :  { %s657_s28 = smul.f32 0.0003, %s772_s27 }
 0x2c9   :  { %v660_v59 = vstv %s657_s28 }
 0x2ca   :  { %v661_v62 = vsel %vm659_vm0, %v660_v59, 0.0 }
 0x2cb   :  { %v663_v63 = vsel %vm658_vm1, %v662_v60, %v661_v62 }
 0x2cc   :  { %664 = vst [vmem:[#allocation12] sm:$0xff] %v663_v63 }
 0x2cd   :  { %895 = shalt.err (!%p892_p1)
}
 0x2ce   :  { %698 = dma.vmem_to_hbm [thread:$0]  %s696_s8, 128, %s1096_s7, [#allocation11]  }
 0x2cf   :  { %908 = dma.done.wait [#allocation5], 1024  }
 0x2d0   :  { %909 = vsyncadd [#allocation5], 4294966272 }
 0x2d1   :  { %910 = dma.done.wait [#allocation11], 2176  }
 0x2d2   :  { %911 = vsyncadd [#allocation11], 4294965120 }
 0x2d3   :  { %708 = vsyncpa [#allocation4], 1 }
 0x2d4   :  { %709 = vsyncpa [#allocation7], 1 }
 0x2d5   :  { %710 = vsyncpa [#allocation5], 1 }
 0x2d6   :  { %711 = vsyncpa [#allocation11], 1 }

</bundles_post_ra>
